<compile_context>
chip_gen: v6e
topology: v6e:2x2x1
jax: 0.10.0
libtpu: 0.0.40
codegen_flags: <defaults>
</compile_context>

<pallas_src>
import functools

import jax
import jax.numpy as jnp
import numpy as np
from jax.experimental import pallas as pl
from jax.experimental.pallas import tpu as pltpu


def _stn_kernel(theta_ref, xyb_ref, x_ref, o_ref, *, Hin, Win, Bn, C):
    # theta_ref: SMEM (N, 6) scalar-prefetch.
    # xyb_ref:   VMEM (2, TILE_P)   base-grid x (row 0) / y (row 1), this tile.
    # x_ref:     VMEM (1, Bn*C, Qn) input pixels for Bn batch elements.
    # o_ref:     VMEM (1, Bn*C, TILE_P) output pixels.
    n_blk = pl.program_id(0)

    xb = xyb_ref[0:1, :]                  # (1, TILE_P)
    yb = xyb_ref[1:2, :]                  # (1, TILE_P)
    tp = xb.shape[-1]

    # Input-pixel col / row indices, derived in-kernel (theta independent; no
    # extra DMA streams, no div/mod).
    jj = jax.lax.broadcasted_iota(jnp.int32, (Win, tp), 0).astype(jnp.float32)
    ii = jax.lax.broadcasted_iota(jnp.int32, (Hin, tp), 0).astype(jnp.float32)

    xin = x_ref[0]                        # (Bn*C, Qn)

    # Static loop over the small compile-time batch block; per-b results are
    # concatenated so the store writes whole 8-sublane vregs at once.
    outs = []
    for b in range(Bn):
        n = n_blk * Bn + b
        t00 = theta_ref[n, 0]
        t01 = theta_ref[n, 1]
        t02 = theta_ref[n, 2]
        t10 = theta_ref[n, 3]
        t11 = theta_ref[n, 4]
        t12 = theta_ref[n, 5]

        # F.affine_grid (align_corners=False) + F.grid_sample unnormalization,
        # all on (1, TILE_P) row vectors.
        gx = t00 * xb + t01 * yb + t02
        gy = t10 * xb + t11 * yb + t12
        ix = (gx + 1.0) * (Win * 0.5) - 0.5     # input x coord per out pixel
        iy = (gy + 1.0) * (Hin * 0.5) - 0.5     # input y coord per out pixel

        # Separable bilinear weights: small factors, then
        # wgt[i*W + j, p] = wy[i, p] * wx[j, p] assembled by sublane concat.
        # Zero padding falls out: out-of-range taps never appear among the
        # i/j indices, matching grid_sample's padding_mode='zeros'.
        wx = jnp.maximum(0.0, 1.0 - jnp.abs(ix - jj))   # (W, TILE_P)
        wy = jnp.maximum(0.0, 1.0 - jnp.abs(iy - ii))   # (H, TILE_P)
        wgt = jnp.concatenate(
            [wx * wy[i:i + 1, :] for i in range(Hin)], axis=0)  # (Qn, TILE_P)

        # (C, Qn) @ (Qn, TILE_P): output stays lane-dense.
        outs.append(jnp.dot(xin[b * C:(b + 1) * C, :], wgt,
                            preferred_element_type=jnp.float32))

    o_ref[0] = jnp.concatenate(outs, axis=0).astype(o_ref.dtype)


def _choose_tiles(N, C, Qn, Pn, *, wgt_budget=2 << 20, xblk_budget=1 << 20):
    """Pick (Bn, tile_p): batch elements per grid step and output-pixel tile."""
    # Batch block: amortize the fixed per-grid-step cost.
    Bn = 1
    for cand in (8, 4, 2):
        if N % cand == 0 and cand * C * Qn * 4 <= xblk_budget:
            Bn = cand
            break

    # Output-pixel tile: largest 128-multiple divisor of Pn whose (Qn, tile_p)
    # f32 weight block stays within a conservative budget (safe on v5e's
    # 16 MiB scoped VMEM and v7x's 64 MiB physical VMEM).
    if Pn <= 128 or Pn % 128 != 0:
        tile_p = Pn
    else:
        tile_p = 128
        t = 256
        while t <= Pn and Qn * t * 4 <= wgt_budget:
            if Pn % t == 0:
                tile_p = t
            t += 128

    # v7x megacore: keep >= 2 (and even) total grid steps so both TensorCores
    # get work; harmless on single-core v5e/v6e.
    def total_steps():
        return (N // Bn) * pl.cdiv(Pn, tile_p)

    for _ in range(8):
        if total_steps() >= 2 and total_steps() % 2 == 0:
            break
        if tile_p % 256 == 0:
            tile_p //= 2
        elif Bn % 2 == 0:
            Bn //= 2
        else:
            break
    return Bn, tile_p


def stn_pallas(x, theta, *, block_n=None, tile_p=None):
    """x: (N, C, H, W) f32, theta: (N, 2, 3) f32 -> (N, C, H, W) f32."""
    N, C, H, W = x.shape
    Qn = H * W                    # input pixels (contraction axis, sublanes)
    Pn = H * W                    # output pixels (lane axis)

    auto_bn, auto_tp = _choose_tiles(N, C, Qn, Pn)
    Bn = auto_bn if block_n is None else block_n
    tp = auto_tp if tile_p is None else tile_p
    assert N % Bn == 0 and Pn % tp == 0
    num_pt = Pn // tp

    theta_flat = theta.reshape(N, 6).astype(jnp.float32)
    # Pack Bn batch elements per grid step (free, contiguous reshape).
    x_pack = x.astype(jnp.float32).reshape(N // Bn, Bn * C, Qn)

    # Theta-independent base grid (align_corners=False pixel centers), merged
    # into a single (2, Pn) array -> one small coordinate DMA stream.
    p = np.arange(Pn)
    xb = (2.0 * (p % W) + 1.0) / W - 1.0
    yb = (2.0 * (p // W) + 1.0) / H - 1.0
    xyb = jnp.asarray(np.stack([xb, yb]).astype(np.float32))   # (2, Pn)

    kernel = functools.partial(_stn_kernel, Hin=H, Win=W, Bn=Bn, C=C)
    out = pl.pallas_call(
        kernel,
        out_shape=jax.ShapeDtypeStruct((N // Bn, Bn * C, Pn), jnp.float32),
        grid_spec=pltpu.PrefetchScalarGridSpec(
            num_scalar_prefetch=1,                    # theta lands in SMEM
            grid=(N // Bn, num_pt),
            in_specs=[
                pl.BlockSpec((2, tp), lambda nb, pt, th: (0, pt)),          # xyb
                pl.BlockSpec((1, Bn * C, Qn), lambda nb, pt, th: (nb, 0, 0)),  # x
            ],
            out_specs=pl.BlockSpec((1, Bn * C, tp),
                                   lambda nb, pt, th: (nb, 0, pt)),
        ),
        compiler_params=pltpu.CompilerParams(
            dimension_semantics=("parallel", "parallel")),
    )(theta_flat, xyb, x_pack)
    return out.reshape(N, C, H, W)


def stn_reference_np(x, theta):
    """Independent NumPy reference of F.affine_grid + F.grid_sample
    (bilinear, zeros padding, align_corners=False)."""
    x = np.asarray(x, np.float32)
    theta = np.asarray(theta, np.float32)
    N, C, H, W = x.shape
    xb = (2.0 * np.arange(W) + 1.0) / W - 1.0
    yb = (2.0 * np.arange(H) + 1.0) / H - 1.0
    out = np.zeros_like(x)
    for n in range(N):
        t = theta[n].reshape(2, 3)
        gx = t[0, 0] * xb[None, :] + t[0, 1] * yb[:, None] + t[0, 2]
        gy = t[1, 0] * xb[None, :] + t[1, 1] * yb[:, None] + t[1, 2]
        ix = (gx + 1.0) * W / 2.0 - 0.5
        iy = (gy + 1.0) * H / 2.0 - 0.5
        for h in range(H):
            for w in range(W):
                fx, fy = ix[h, w], iy[h, w]
                x0, y0 = int(np.floor(fx)), int(np.floor(fy))
                for yy in (y0, y0 + 1):
                    for xx in (x0, x0 + 1):
                        wgt = max(0.0, 1.0 - abs(fx - xx)) * \
                              max(0.0, 1.0 - abs(fy - yy))
                        if 0 <= yy < H and 0 <= xx < W and wgt > 0.0:
                            out[n, :, h, w] += wgt * x[n, :, yy, xx]
    return out


if __name__ == "__main__":
    N, C, H, W = 2, 4, 16, 16

    key = jax.random.PRNGKey(0)
    x = jax.random.normal(key, (N, C, H, W), dtype=jnp.float32)

    # Deterministic theta (the module takes theta in __init__): small rotation
    # + translation per batch element, shape (N, 2, 3).
    thetas = []
    for ang, (tx, ty) in zip((0.1, -0.2), ((0.05, -0.1), (-0.2, 0.15))):
        ca, sa = float(np.cos(ang)), float(np.sin(ang))
        thetas.append([[ca, -sa, tx], [sa, ca, ty]])
    theta = jnp.array(thetas, dtype=jnp.float32)

    out = stn_pallas(x, theta)
    out = jax.block_until_ready(out)

    ref = stn_reference_np(np.asarray(x), np.asarray(theta))
    assert out.shape == (N, C, H, W)
    np.testing.assert_allclose(np.asarray(out), ref, atol=1e-3, rtol=1e-3)

    print("KERNEL_OK")
</pallas_src>

<mosaic_0001>
module attributes {stable_mosaic.version = 11 : i64} {
  func.func @_stn_kernel(%arg0: i32, %arg1: i32, %arg2: memref<2x6xf32, #tpu.memory_space<smem>>, %arg3: memref<2x128xf32, #tpu.memory_space<vmem>>, %arg4: memref<1x8x256xf32, #tpu.memory_space<vmem>>, %arg5: memref<1x8x128xf32, #tpu.memory_space<vmem>>) attributes {dimension_semantics = [#tpu.dimension_semantics<parallel>, #tpu.dimension_semantics<parallel>], iteration_bounds = array<i64: 1, 2>, scalar_prefetch = 1 : i64, scratch_operands = 0 : i64, tpu.core_type = #tpu.core_type<tc>, window_params = [{transform_indices = @transform_0, window_bounds = array<i64: 2, 128>}, {transform_indices = @transform_1, window_bounds = array<i64: 1, 8, 256>}, {transform_indices = @transform_2, window_bounds = array<i64: 1, 8, 128>}]} {
    %c0 = arith.constant 0 : index
    %c0_0 = arith.constant 0 : index
    %0 = vector.load %arg3[%c0, %c0_0] : memref<2x128xf32, #tpu.memory_space<vmem>>, vector<1x128xf32>
    %c1 = arith.constant 1 : index
    %c0_1 = arith.constant 0 : index
    %1 = vector.load %arg3[%c1, %c0_1] : memref<2x128xf32, #tpu.memory_space<vmem>>, vector<1x128xf32>
    %2 = tpu.iota {dimensions = array<i32: 0>} : vector<16x128xi32>
    %3 = arith.sitofp %2 : vector<16x128xi32> to vector<16x128xf32>
    %4 = tpu.iota {dimensions = array<i32: 0>} : vector<16x128xi32>
    %5 = arith.sitofp %4 : vector<16x128xi32> to vector<16x128xf32>
    %c0_2 = arith.constant 0 : index
    %c0_3 = arith.constant 0 : index
    %c0_4 = arith.constant 0 : index
    %6 = vector.load %arg4[%c0_2, %c0_3, %c0_4] : memref<1x8x256xf32, #tpu.memory_space<vmem>>, vector<1x8x256xf32>
    %7 = vector.shape_cast %6 : vector<1x8x256xf32> to vector<8x256xf32>
    %c2_i32 = arith.constant 2 : i32
    %8 = arith.muli %arg0, %c2_i32 : i32
    %c0_i32 = arith.constant 0 : i32
    %9 = arith.addi %8, %c0_i32 : i32
    %10 = arith.index_cast %9 : i32 to index
    %c0_5 = arith.constant 0 : index
    %11 = memref.load %arg2[%10, %c0_5] : memref<2x6xf32, #tpu.memory_space<smem>>
    %12 = arith.index_cast %9 : i32 to index
    %c1_6 = arith.constant 1 : index
    %13 = memref.load %arg2[%12, %c1_6] : memref<2x6xf32, #tpu.memory_space<smem>>
    %14 = arith.index_cast %9 : i32 to index
    %c2 = arith.constant 2 : index
    %15 = memref.load %arg2[%14, %c2] : memref<2x6xf32, #tpu.memory_space<smem>>
    %16 = arith.index_cast %9 : i32 to index
    %c3 = arith.constant 3 : index
    %17 = memref.load %arg2[%16, %c3] : memref<2x6xf32, #tpu.memory_space<smem>>
    %18 = arith.index_cast %9 : i32 to index
    %c4 = arith.constant 4 : index
    %19 = memref.load %arg2[%18, %c4] : memref<2x6xf32, #tpu.memory_space<smem>>
    %20 = arith.index_cast %9 : i32 to index
    %c5 = arith.constant 5 : index
    %21 = memref.load %arg2[%20, %c5] : memref<2x6xf32, #tpu.memory_space<smem>>
    %22 = vector.broadcast %11 : f32 to vector<1x128xf32>
    %23 = arith.mulf %22, %0 : vector<1x128xf32>
    %24 = vector.broadcast %13 : f32 to vector<1x128xf32>
    %25 = arith.mulf %24, %1 : vector<1x128xf32>
    %26 = arith.addf %23, %25 : vector<1x128xf32>
    %27 = vector.broadcast %15 : f32 to vector<1x128xf32>
    %28 = arith.addf %26, %27 : vector<1x128xf32>
    %29 = vector.broadcast %17 : f32 to vector<1x128xf32>
    %30 = arith.mulf %29, %0 : vector<1x128xf32>
    %31 = vector.broadcast %19 : f32 to vector<1x128xf32>
    %32 = arith.mulf %31, %1 : vector<1x128xf32>
    %33 = arith.addf %30, %32 : vector<1x128xf32>
    %34 = vector.broadcast %21 : f32 to vector<1x128xf32>
    %35 = arith.addf %33, %34 : vector<1x128xf32>
    %cst = arith.constant 1.000000e+00 : f32
    %36 = vector.broadcast %cst : f32 to vector<1x128xf32>
    %37 = arith.addf %28, %36 : vector<1x128xf32>
    %cst_7 = arith.constant 8.000000e+00 : f32
    %38 = vector.broadcast %cst_7 : f32 to vector<1x128xf32>
    %39 = arith.mulf %37, %38 : vector<1x128xf32>
    %cst_8 = arith.constant 5.000000e-01 : f32
    %40 = vector.broadcast %cst_8 : f32 to vector<1x128xf32>
    %41 = arith.subf %39, %40 : vector<1x128xf32>
    %cst_9 = arith.constant 1.000000e+00 : f32
    %42 = vector.broadcast %cst_9 : f32 to vector<1x128xf32>
    %43 = arith.addf %35, %42 : vector<1x128xf32>
    %cst_10 = arith.constant 8.000000e+00 : f32
    %44 = vector.broadcast %cst_10 : f32 to vector<1x128xf32>
    %45 = arith.mulf %43, %44 : vector<1x128xf32>
    %cst_11 = arith.constant 5.000000e-01 : f32
    %46 = vector.broadcast %cst_11 : f32 to vector<1x128xf32>
    %47 = arith.subf %45, %46 : vector<1x128xf32>
    %48 = vector.broadcast %41 : vector<1x128xf32> to vector<16x128xf32>
    %49 = arith.subf %48, %3 : vector<16x128xf32>
    %50 = math.absf %49 : vector<16x128xf32>
    %cst_12 = arith.constant 1.000000e+00 : f32
    %51 = vector.broadcast %cst_12 : f32 to vector<16x128xf32>
    %52 = arith.subf %51, %50 : vector<16x128xf32>
    %cst_13 = arith.constant 0.000000e+00 : f32
    %53 = vector.broadcast %cst_13 : f32 to vector<16x128xf32>
    %54 = arith.maximumf %53, %52 : vector<16x128xf32>
    %55 = vector.broadcast %47 : vector<1x128xf32> to vector<16x128xf32>
    %56 = arith.subf %55, %5 : vector<16x128xf32>
    %57 = math.absf %56 : vector<16x128xf32>
    %cst_14 = arith.constant 1.000000e+00 : f32
    %58 = vector.broadcast %cst_14 : f32 to vector<16x128xf32>
    %59 = arith.subf %58, %57 : vector<16x128xf32>
    %cst_15 = arith.constant 0.000000e+00 : f32
    %60 = vector.broadcast %cst_15 : f32 to vector<16x128xf32>
    %61 = arith.maximumf %60, %59 : vector<16x128xf32>
    %62 = vector.extract_strided_slice %61 {offsets = [0, 0], sizes = [1, 128], strides = [1, 1]} : vector<16x128xf32> to vector<1x128xf32>
    %63 = vector.broadcast %62 : vector<1x128xf32> to vector<16x128xf32>
    %64 = arith.mulf %54, %63 : vector<16x128xf32>
    %65 = vector.extract_strided_slice %61 {offsets = [1, 0], sizes = [1, 128], strides = [1, 1]} : vector<16x128xf32> to vector<1x128xf32>
    %66 = vector.broadcast %65 : vector<1x128xf32> to vector<16x128xf32>
    %67 = arith.mulf %54, %66 : vector<16x128xf32>
    %68 = vector.extract_strided_slice %61 {offsets = [2, 0], sizes = [1, 128], strides = [1, 1]} : vector<16x128xf32> to vector<1x128xf32>
    %69 = vector.broadcast %68 : vector<1x128xf32> to vector<16x128xf32>
    %70 = arith.mulf %54, %69 : vector<16x128xf32>
    %71 = vector.extract_strided_slice %61 {offsets = [3, 0], sizes = [1, 128], strides = [1, 1]} : vector<16x128xf32> to vector<1x128xf32>
    %72 = vector.broadcast %71 : vector<1x128xf32> to vector<16x128xf32>
    %73 = arith.mulf %54, %72 : vector<16x128xf32>
    %74 = vector.extract_strided_slice %61 {offsets = [4, 0], sizes = [1, 128], strides = [1, 1]} : vector<16x128xf32> to vector<1x128xf32>
    %75 = vector.broadcast %74 : vector<1x128xf32> to vector<16x128xf32>
    %76 = arith.mulf %54, %75 : vector<16x128xf32>
    %77 = vector.extract_strided_slice %61 {offsets = [5, 0], sizes = [1, 128], strides = [1, 1]} : vector<16x128xf32> to vector<1x128xf32>
    %78 = vector.broadcast %77 : vector<1x128xf32> to vector<16x128xf32>
    %79 = arith.mulf %54, %78 : vector<16x128xf32>
    %80 = vector.extract_strided_slice %61 {offsets = [6, 0], sizes = [1, 128], strides = [1, 1]} : vector<16x128xf32> to vector<1x128xf32>
    %81 = vector.broadcast %80 : vector<1x128xf32> to vector<16x128xf32>
    %82 = arith.mulf %54, %81 : vector<16x128xf32>
    %83 = vector.extract_strided_slice %61 {offsets = [7, 0], sizes = [1, 128], strides = [1, 1]} : vector<16x128xf32> to vector<1x128xf32>
    %84 = vector.broadcast %83 : vector<1x128xf32> to vector<16x128xf32>
    %85 = arith.mulf %54, %84 : vector<16x128xf32>
    %86 = vector.extract_strided_slice %61 {offsets = [8, 0], sizes = [1, 128], strides = [1, 1]} : vector<16x128xf32> to vector<1x128xf32>
    %87 = vector.broadcast %86 : vector<1x128xf32> to vector<16x128xf32>
    %88 = arith.mulf %54, %87 : vector<16x128xf32>
    %89 = vector.extract_strided_slice %61 {offsets = [9, 0], sizes = [1, 128], strides = [1, 1]} : vector<16x128xf32> to vector<1x128xf32>
    %90 = vector.broadcast %89 : vector<1x128xf32> to vector<16x128xf32>
    %91 = arith.mulf %54, %90 : vector<16x128xf32>
    %92 = vector.extract_strided_slice %61 {offsets = [10, 0], sizes = [1, 128], strides = [1, 1]} : vector<16x128xf32> to vector<1x128xf32>
    %93 = vector.broadcast %92 : vector<1x128xf32> to vector<16x128xf32>
    %94 = arith.mulf %54, %93 : vector<16x128xf32>
    %95 = vector.extract_strided_slice %61 {offsets = [11, 0], sizes = [1, 128], strides = [1, 1]} : vector<16x128xf32> to vector<1x128xf32>
    %96 = vector.broadcast %95 : vector<1x128xf32> to vector<16x128xf32>
    %97 = arith.mulf %54, %96 : vector<16x128xf32>
    %98 = vector.extract_strided_slice %61 {offsets = [12, 0], sizes = [1, 128], strides = [1, 1]} : vector<16x128xf32> to vector<1x128xf32>
    %99 = vector.broadcast %98 : vector<1x128xf32> to vector<16x128xf32>
    %100 = arith.mulf %54, %99 : vector<16x128xf32>
    %101 = vector.extract_strided_slice %61 {offsets = [13, 0], sizes = [1, 128], strides = [1, 1]} : vector<16x128xf32> to vector<1x128xf32>
    %102 = vector.broadcast %101 : vector<1x128xf32> to vector<16x128xf32>
    %103 = arith.mulf %54, %102 : vector<16x128xf32>
    %104 = vector.extract_strided_slice %61 {offsets = [14, 0], sizes = [1, 128], strides = [1, 1]} : vector<16x128xf32> to vector<1x128xf32>
    %105 = vector.broadcast %104 : vector<1x128xf32> to vector<16x128xf32>
    %106 = arith.mulf %54, %105 : vector<16x128xf32>
    %107 = vector.extract_strided_slice %61 {offsets = [15, 0], sizes = [1, 128], strides = [1, 1]} : vector<16x128xf32> to vector<1x128xf32>
    %108 = vector.broadcast %107 : vector<1x128xf32> to vector<16x128xf32>
    %109 = arith.mulf %54, %108 : vector<16x128xf32>
    %110 = tpu.concatenate %64, %67, %70, %73, %76, %79, %82, %85, %88, %91, %94, %97, %100, %103, %106, %109 in 0 : vector<16x128xf32>, vector<16x128xf32>, vector<16x128xf32>, vector<16x128xf32>, vector<16x128xf32>, vector<16x128xf32>, vector<16x128xf32>, vector<16x128xf32>, vector<16x128xf32>, vector<16x128xf32>, vector<16x128xf32>, vector<16x128xf32>, vector<16x128xf32>, vector<16x128xf32>, vector<16x128xf32>, vector<16x128xf32> -> vector<256x128xf32>
    %111 = vector.extract_strided_slice %7 {offsets = [0, 0], sizes = [4, 256], strides = [1, 1]} : vector<8x256xf32> to vector<4x256xf32>
    %cst_16 = arith.constant dense<0.000000e+00> : vector<4x128xf32>
    %112 = tpu.matmul %111, %110, %cst_16 {dimension_numbers = #tpu.dot_dimension_numbers<[1], [0], [0], [1], [0, 0, 1, 1], [], []>} : vector<4x256xf32>, vector<256x128xf32>, vector<4x128xf32> -> vector<4x128xf32>
    %c2_i32_17 = arith.constant 2 : i32
    %113 = arith.muli %arg0, %c2_i32_17 : i32
    %c1_i32 = arith.constant 1 : i32
    %114 = arith.addi %113, %c1_i32 : i32
    %115 = arith.index_cast %114 : i32 to index
    %c0_18 = arith.constant 0 : index
    %116 = memref.load %arg2[%115, %c0_18] : memref<2x6xf32, #tpu.memory_space<smem>>
    %117 = arith.index_cast %114 : i32 to index
    %c1_19 = arith.constant 1 : index
    %118 = memref.load %arg2[%117, %c1_19] : memref<2x6xf32, #tpu.memory_space<smem>>
    %119 = arith.index_cast %114 : i32 to index
    %c2_20 = arith.constant 2 : index
    %120 = memref.load %arg2[%119, %c2_20] : memref<2x6xf32, #tpu.memory_space<smem>>
    %121 = arith.index_cast %114 : i32 to index
    %c3_21 = arith.constant 3 : index
    %122 = memref.load %arg2[%121, %c3_21] : memref<2x6xf32, #tpu.memory_space<smem>>
    %123 = arith.index_cast %114 : i32 to index
    %c4_22 = arith.constant 4 : index
    %124 = memref.load %arg2[%123, %c4_22] : memref<2x6xf32, #tpu.memory_space<smem>>
    %125 = arith.index_cast %114 : i32 to index
    %c5_23 = arith.constant 5 : index
    %126 = memref.load %arg2[%125, %c5_23] : memref<2x6xf32, #tpu.memory_space<smem>>
    %127 = vector.broadcast %116 : f32 to vector<1x128xf32>
    %128 = arith.mulf %127, %0 : vector<1x128xf32>
    %129 = vector.broadcast %118 : f32 to vector<1x128xf32>
    %130 = arith.mulf %129, %1 : vector<1x128xf32>
    %131 = arith.addf %128, %130 : vector<1x128xf32>
    %132 = vector.broadcast %120 : f32 to vector<1x128xf32>
    %133 = arith.addf %131, %132 : vector<1x128xf32>
    %134 = vector.broadcast %122 : f32 to vector<1x128xf32>
    %135 = arith.mulf %134, %0 : vector<1x128xf32>
    %136 = vector.broadcast %124 : f32 to vector<1x128xf32>
    %137 = arith.mulf %136, %1 : vector<1x128xf32>
    %138 = arith.addf %135, %137 : vector<1x128xf32>
    %139 = vector.broadcast %126 : f32 to vector<1x128xf32>
    %140 = arith.addf %138, %139 : vector<1x128xf32>
    %cst_24 = arith.constant 1.000000e+00 : f32
    %141 = vector.broadcast %cst_24 : f32 to vector<1x128xf32>
    %142 = arith.addf %133, %141 : vector<1x128xf32>
    %cst_25 = arith.constant 8.000000e+00 : f32
    %143 = vector.broadcast %cst_25 : f32 to vector<1x128xf32>
    %144 = arith.mulf %142, %143 : vector<1x128xf32>
    %cst_26 = arith.constant 5.000000e-01 : f32
    %145 = vector.broadcast %cst_26 : f32 to vector<1x128xf32>
    %146 = arith.subf %144, %145 : vector<1x128xf32>
    %cst_27 = arith.constant 1.000000e+00 : f32
    %147 = vector.broadcast %cst_27 : f32 to vector<1x128xf32>
    %148 = arith.addf %140, %147 : vector<1x128xf32>
    %cst_28 = arith.constant 8.000000e+00 : f32
    %149 = vector.broadcast %cst_28 : f32 to vector<1x128xf32>
    %150 = arith.mulf %148, %149 : vector<1x128xf32>
    %cst_29 = arith.constant 5.000000e-01 : f32
    %151 = vector.broadcast %cst_29 : f32 to vector<1x128xf32>
    %152 = arith.subf %150, %151 : vector<1x128xf32>
    %153 = vector.broadcast %146 : vector<1x128xf32> to vector<16x128xf32>
    %154 = arith.subf %153, %3 : vector<16x128xf32>
    %155 = math.absf %154 : vector<16x128xf32>
    %cst_30 = arith.constant 1.000000e+00 : f32
    %156 = vector.broadcast %cst_30 : f32 to vector<16x128xf32>
    %157 = arith.subf %156, %155 : vector<16x128xf32>
    %cst_31 = arith.constant 0.000000e+00 : f32
    %158 = vector.broadcast %cst_31 : f32 to vector<16x128xf32>
    %159 = arith.maximumf %158, %157 : vector<16x128xf32>
    %160 = vector.broadcast %152 : vector<1x128xf32> to vector<16x128xf32>
    %161 = arith.subf %160, %5 : vector<16x128xf32>
    %162 = math.absf %161 : vector<16x128xf32>
    %cst_32 = arith.constant 1.000000e+00 : f32
    %163 = vector.broadcast %cst_32 : f32 to vector<16x128xf32>
    %164 = arith.subf %163, %162 : vector<16x128xf32>
    %cst_33 = arith.constant 0.000000e+00 : f32
    %165 = vector.broadcast %cst_33 : f32 to vector<16x128xf32>
    %166 = arith.maximumf %165, %164 : vector<16x128xf32>
    %167 = vector.extract_strided_slice %166 {offsets = [0, 0], sizes = [1, 128], strides = [1, 1]} : vector<16x128xf32> to vector<1x128xf32>
    %168 = vector.broadcast %167 : vector<1x128xf32> to vector<16x128xf32>
    %169 = arith.mulf %159, %168 : vector<16x128xf32>
    %170 = vector.extract_strided_slice %166 {offsets = [1, 0], sizes = [1, 128], strides = [1, 1]} : vector<16x128xf32> to vector<1x128xf32>
    %171 = vector.broadcast %170 : vector<1x128xf32> to vector<16x128xf32>
    %172 = arith.mulf %159, %171 : vector<16x128xf32>
    %173 = vector.extract_strided_slice %166 {offsets = [2, 0], sizes = [1, 128], strides = [1, 1]} : vector<16x128xf32> to vector<1x128xf32>
    %174 = vector.broadcast %173 : vector<1x128xf32> to vector<16x128xf32>
    %175 = arith.mulf %159, %174 : vector<16x128xf32>
    %176 = vector.extract_strided_slice %166 {offsets = [3, 0], sizes = [1, 128], strides = [1, 1]} : vector<16x128xf32> to vector<1x128xf32>
    %177 = vector.broadcast %176 : vector<1x128xf32> to vector<16x128xf32>
    %178 = arith.mulf %159, %177 : vector<16x128xf32>
    %179 = vector.extract_strided_slice %166 {offsets = [4, 0], sizes = [1, 128], strides = [1, 1]} : vector<16x128xf32> to vector<1x128xf32>
    %180 = vector.broadcast %179 : vector<1x128xf32> to vector<16x128xf32>
    %181 = arith.mulf %159, %180 : vector<16x128xf32>
    %182 = vector.extract_strided_slice %166 {offsets = [5, 0], sizes = [1, 128], strides = [1, 1]} : vector<16x128xf32> to vector<1x128xf32>
    %183 = vector.broadcast %182 : vector<1x128xf32> to vector<16x128xf32>
    %184 = arith.mulf %159, %183 : vector<16x128xf32>
    %185 = vector.extract_strided_slice %166 {offsets = [6, 0], sizes = [1, 128], strides = [1, 1]} : vector<16x128xf32> to vector<1x128xf32>
    %186 = vector.broadcast %185 : vector<1x128xf32> to vector<16x128xf32>
    %187 = arith.mulf %159, %186 : vector<16x128xf32>
    %188 = vector.extract_strided_slice %166 {offsets = [7, 0], sizes = [1, 128], strides = [1, 1]} : vector<16x128xf32> to vector<1x128xf32>
    %189 = vector.broadcast %188 : vector<1x128xf32> to vector<16x128xf32>
    %190 = arith.mulf %159, %189 : vector<16x128xf32>
    %191 = vector.extract_strided_slice %166 {offsets = [8, 0], sizes = [1, 128], strides = [1, 1]} : vector<16x128xf32> to vector<1x128xf32>
    %192 = vector.broadcast %191 : vector<1x128xf32> to vector<16x128xf32>
    %193 = arith.mulf %159, %192 : vector<16x128xf32>
    %194 = vector.extract_strided_slice %166 {offsets = [9, 0], sizes = [1, 128], strides = [1, 1]} : vector<16x128xf32> to vector<1x128xf32>
    %195 = vector.broadcast %194 : vector<1x128xf32> to vector<16x128xf32>
    %196 = arith.mulf %159, %195 : vector<16x128xf32>
    %197 = vector.extract_strided_slice %166 {offsets = [10, 0], sizes = [1, 128], strides = [1, 1]} : vector<16x128xf32> to vector<1x128xf32>
    %198 = vector.broadcast %197 : vector<1x128xf32> to vector<16x128xf32>
    %199 = arith.mulf %159, %198 : vector<16x128xf32>
    %200 = vector.extract_strided_slice %166 {offsets = [11, 0], sizes = [1, 128], strides = [1, 1]} : vector<16x128xf32> to vector<1x128xf32>
    %201 = vector.broadcast %200 : vector<1x128xf32> to vector<16x128xf32>
    %202 = arith.mulf %159, %201 : vector<16x128xf32>
    %203 = vector.extract_strided_slice %166 {offsets = [12, 0], sizes = [1, 128], strides = [1, 1]} : vector<16x128xf32> to vector<1x128xf32>
    %204 = vector.broadcast %203 : vector<1x128xf32> to vector<16x128xf32>
    %205 = arith.mulf %159, %204 : vector<16x128xf32>
    %206 = vector.extract_strided_slice %166 {offsets = [13, 0], sizes = [1, 128], strides = [1, 1]} : vector<16x128xf32> to vector<1x128xf32>
    %207 = vector.broadcast %206 : vector<1x128xf32> to vector<16x128xf32>
    %208 = arith.mulf %159, %207 : vector<16x128xf32>
    %209 = vector.extract_strided_slice %166 {offsets = [14, 0], sizes = [1, 128], strides = [1, 1]} : vector<16x128xf32> to vector<1x128xf32>
    %210 = vector.broadcast %209 : vector<1x128xf32> to vector<16x128xf32>
    %211 = arith.mulf %159, %210 : vector<16x128xf32>
    %212 = vector.extract_strided_slice %166 {offsets = [15, 0], sizes = [1, 128], strides = [1, 1]} : vector<16x128xf32> to vector<1x128xf32>
    %213 = vector.broadcast %212 : vector<1x128xf32> to vector<16x128xf32>
    %214 = arith.mulf %159, %213 : vector<16x128xf32>
    %215 = tpu.concatenate %169, %172, %175, %178, %181, %184, %187, %190, %193, %196, %199, %202, %205, %208, %211, %214 in 0 : vector<16x128xf32>, vector<16x128xf32>, vector<16x128xf32>, vector<16x128xf32>, vector<16x128xf32>, vector<16x128xf32>, vector<16x128xf32>, vector<16x128xf32>, vector<16x128xf32>, vector<16x128xf32>, vector<16x128xf32>, vector<16x128xf32>, vector<16x128xf32>, vector<16x128xf32>, vector<16x128xf32>, vector<16x128xf32> -> vector<256x128xf32>
    %216 = vector.extract_strided_slice %7 {offsets = [4, 0], sizes = [4, 256], strides = [1, 1]} : vector<8x256xf32> to vector<4x256xf32>
    %cst_34 = arith.constant dense<0.000000e+00> : vector<4x128xf32>
    %217 = tpu.matmul %216, %215, %cst_34 {dimension_numbers = #tpu.dot_dimension_numbers<[1], [0], [0], [1], [0, 0, 1, 1], [], []>} : vector<4x256xf32>, vector<256x128xf32>, vector<4x128xf32> -> vector<4x128xf32>
    %218 = tpu.concatenate %112, %217 in 0 : vector<4x128xf32>, vector<4x128xf32> -> vector<8x128xf32>
    %c0_35 = arith.constant 0 : index
    %c0_36 = arith.constant 0 : index
    %c0_37 = arith.constant 0 : index
    %219 = vector.load %arg5[%c0_35, %c0_36, %c0_37] : memref<1x8x128xf32, #tpu.memory_space<vmem>>, vector<1x8x128xf32>
    %220 = vector.shape_cast %219 : vector<1x8x128xf32> to vector<8x128xf32>
    %221 = vector.shape_cast %218 : vector<8x128xf32> to vector<1x8x128xf32>
    tpu.vector_store %arg5[%c0_35, %c0_36, %c0_37], %221 {strides = array<i32>} : memref<1x8x128xf32, #tpu.memory_space<vmem>>, vector<1x8x128xf32>,
    return
  }
  func.func @transform_0(%arg0: i32, %arg1: i32, %arg2: memref<2x6xf32, #tpu.memory_space<smem>>) -> (i32, i32) {
    %c0_i32 = arith.constant 0 : i32
    %c0_i32_0 = arith.constant 0 : i32
    return %c0_i32, %arg1 : i32, i32
  }
  func.func @transform_1(%arg0: i32, %arg1: i32, %arg2: memref<2x6xf32, #tpu.memory_space<smem>>) -> (i32, i32, i32) {
    %c0_i32 = arith.constant 0 : i32
    %c0_i32_0 = arith.constant 0 : i32
    %c0_i32_1 = arith.constant 0 : i32
    return %arg0, %c0_i32, %c0_i32_0 : i32, i32, i32
  }
  func.func @transform_2(%arg0: i32, %arg1: i32, %arg2: memref<2x6xf32, #tpu.memory_space<smem>>) -> (i32, i32, i32) {
    %c0_i32 = arith.constant 0 : i32
    %c0_i32_0 = arith.constant 0 : i32
    return %arg0, %c0_i32, %arg1 : i32, i32, i32
  }
}

</mosaic_0001>

<bundles_post_ra>
// kernel: tpu_custom_call.1
= control target key start
LH: loop header
LB: loop body
LE: loop exit
PB: predicated region body
PF: predicated region fallthrough
CT: control target
= control target key end

     0   :  { %s1098_s12 = smov [#allocation3]   ;;  %s1433_s0 = inlined_call_operand.hbm [shape: f32[2,6], index: 0, kind: input, shape index: {}]   ;;  %s1434_s1 = inlined_call_operand.hbm [shape: f32[2,256], index: 1, kind: input, shape index: {}]   ;;  %s1435_s2 = inlined_call_operand.hbm [shape: f32[1,8,256], index: 2, kind: input, shape index: {}]   ;;  %s1436_s3 = inlined_call_operand.hbm [shape: f32[1,8,256], index: 3, kind: output, shape index: {}]  }
   0x1   :  { %9 = dma.hbm_to_smem %s1433_s0, 32, %s1098_s12, [#allocation2] }
   0x2   :  { %1060 = dma.done.wait [#allocation2], 32 }
   0x3   :  { %1061 = vsyncadd [#allocation2], 4294967264 }
   0x4   :  { %11 = sfence }
   0x5   :  { %12 = vsyncpa [#allocation5], 0 }
   0x6   :  { %14 = vsyncpa [#allocation5 + $0x1], 0 }
   0x7   :  { %15 = vsyncpa [#allocation8], 0 }
   0x8   :  { %16 = vsyncpa [#allocation6], 0 }
   0x9   :  { %18 = vsyncpa [#allocation6 + $0x1], 0  ;;  %s1125_s15 = smov 0   ;;  %s1127_s16 = smov 0  }
   0xa   :  { %s1129_s17 = smov 0   ;;  %s1131_s18 = smov 0  }
   0xb   :  { %s1133_s19 = smov 0   ;;  %s1135_s20 = smov 0  }
   0xc LB: > { %s774_s0 = sadd.s32 4294967295, %s1096_s20   ;;  %s775_s21 = sadd.s32 4294967294, %s1096_s20   ;;  %s1096_s20 = sphi %s1135_s20, %s24_s20   ;;  %s1092_s19 = sphi %s1133_s19, %s1453_s19   ;;  %s1088_s18 = sphi %s1131_s18, %s1452_s18   ;;  %s1084_s17 = sphi %s1129_s17, %s1451_s17   ;;  %s1080_s16 = sphi %s1127_s16, %s1450_s16   ;;  %s1076_s15 = sphi %s1125_s15, %s1449_s15  }
   0xd   : > { %p56_p0 = scmp.ne.s32.totalorder %s1080_s16, %s1076_s15  ;;  %p1159_p1 = scmp.eq.s32.totalorder %s774_s0, 0 }
   0xe   : > { %p1163_p2 = scmp.eq.s32.totalorder %s774_s0, 1  ;;  %p114_p3 = scmp.eq.s32.totalorder %s775_s21, 1 }
   0xf   : > { %p1169_p4 = por %p1159_p1, %p56_p0  ;;  %p776_p5 = scmp.ge.s32.totalorder %s1096_s20, 1 }
  0x10   : > { %p1174_p6 = por %p114_p3, %p56_p0  ;;  %p121_p7 = scmp.lt.s32.totalorder %s1096_s20, 3 }
  0x11   : > { %s1440_s24 = scalar_select %p1169_p4, 1, 0 }
  0x12   : > { %s1441_s25 = scalar_select %p1174_p6, 1, 0 }
  0x13   : > { %p1179_p8 = pnand %p776_p5, %p121_p7  ;;  %s1099_s27 = smov [#allocation7]  }
  0x14   : > { %s137_s28 = sshll.u32 %s1099_s27, 4  ;;  %s33_s30 = sadd.s32 1, %s1092_s19  ;;  %s138_s28 = int_to_ptr.vmem [resolvable:$true] %s137_s28 }
  0x15   : > { %p882_p10 = pneg %p1179_p8  ;;  %s43_s4 = sadd.s32 1, %s1084_s17 }
  0x16   : > { %p34_p12 = scmp.ge.s32.totalorder %s33_s30, 2  ;;  %s967_s5 = scalar_lea.vmem %s138_s28, 256 }
  0x17   : > { %p1188_p11 = pnand %p882_p10, %p1159_p1  ;;  %p968_p0 = scmp.ne.s32.totalorder %s138_s28, %s967_s5 }
  0x18   : > { %p975_p7 = scmp.lt.s32.totalorder %s138_s28, %s138_s28  ;;  %p976_p6 = scmp.lt.s32.totalorder %s967_s5, %s967_s5 }
  0x19   : > { %p958_p13 = pneg %p1188_p11 }
  0x1a   : > { %p977_p9 = por %p976_p6, %p975_p7 }
  0x1b   : > { %p970_p3 = pnand %p968_p0, %p958_p13 }
  0x1d   : > { %p971_p5 = pneg %p970_p3 }
  0x1f   : > { %p978_p4 = pnand %p977_p9, %p971_p5 }
  0x21   : > { %981 = shalt.err (!%p978_p4)
}
  0x22   : > { %885 = dma.hbm_to_vmem [thread:$0]  (!%p1188_p11), %s1435_s2, 256, %s138_s28, [#allocation8]  }
  0x23   : > { %s1455_s30 = smov (%p34_p12, %s33_s30), 0  ;;  %p50_p6 = scmp.ne.s32.totalorder %s1084_s17, %s1080_s16 }
  0x24   : > { %p51_p4 = scmp.eq.s32.totalorder %s1096_s20, 0  ;;  %s40_s8 = ssub.s32 %s1092_s19, %s1455_s30 }
  0x25   : > { %p895_p9 = scmp.lt.s32.totalorder %s1096_s20, 2  ;;  %p41_p10 = scmp.eq.s32.totalorder %s40_s8, 0 }
  0x26   : > { %p52_p13 = por %p51_p4, %p50_p6  ;;  %p1211_p0 = por %p1163_p2, %p50_p6 }
  0x27   : > { %s148_s10 = sand.u32 1, %s1084_s17   ;;  %s780_s13 = sshll.u32 %s1092_s19, 5 }
  0x28   : > { %s1217_s11 = scalar_select %p41_p10, %s1084_s17, %s43_s4  }
  0x29   : > { %s779_s12 = sshll.u32 %s148_s10, 1  ;;  %s157_s21 = scalar_lea.hbm %s1434_s1, %s780_s13 }
  0x2a   : > { %s152_s27 = scalar_lea.vmem [#allocation4], %s779_s12  ;;  %p1223_p11 = pnand %p895_p9, %p52_p13 }
  0x2b   : > { %s159_s28 = sshll.u32 %s152_s27, 4  ;;  %s149_s23 = scalar_lea.sflag [#allocation5], %s148_s10  ;;  %s160_s28 = int_to_ptr.vmem [resolvable:$true] %s159_s28 }
  0x2c   : > { %p984_p2 = pneg %p1223_p11  ;;  %s995_s5 = scalar_lea.vmem %s160_s28, 32 }
  0x2d   : > { %p996_p12 = scmp.ne.s32.totalorder %s160_s28, %s995_s5  ;;  %s1100_s4 = smov [#allocation4]  }
  0x2e   : > { %s1000_s6 = sshll.u32 %s1100_s4, 4  ;;  %s1001_s6 = int_to_ptr.vmem [resolvable:$false] %s1000_s6 }
  0x2f   : > { %p998_p3 = pnand %p996_p12, %p984_p2  ;;  %s1002_s7 = scalar_lea.vmem %s1001_s6, 64 }
  0x30   : > { %p1003_p7 = scmp.lt.s32.totalorder %s160_s28, %s1001_s6  ;;  %p1004_p6 = scmp.lt.s32.totalorder %s1002_s7, %s995_s5 }
  0x31   : > { %p999_p5 = pneg %p998_p3 }
  0x32   : > { %p1005_p4 = por %p1004_p6, %p1003_p7 }
  0x34   : > { %p1006_p10 = pnand %p1005_p4, %p999_p5 }
  0x36   : > { %1009 = shalt.err (!%p1006_p10)
}
  0x37   : > { %889 = dma.hbm_to_vmem [thread:$0]  (!%p1223_p11), %s157_s21, 32, %s160_s28, %s149_s23  }
  0x38   : > { %168 = sbr.rel (%p1179_p8) target bundleno = 352 (0x160), region = 28  ;;  %s1234_s8 = sand.u32 (!%p1179_p8), 1, %s1080_s16  }
  0x39   : > { %s782_s10 = sshll.u32 (!%p1179_p8), %s1234_s8, 1  ;;  %s171_s12 = scalar_lea.sflag (!%p1179_p8), [#allocation5], %s1234_s8 }
  0x3a   : > { %s174_s13 = scalar_lea.vmem (!%p1179_p8), [#allocation4], %s782_s10  ;;  %p1446_p9 = scmp.ne.s32.totalorder (!%p1179_p8), %s1440_s24, 0 }
  0x3d   : > { %1063 = dma.done.wait (%p1446_p9), %s171_s12, 32  }
  0x3e   : > { %1065 = vsyncadd (%p1446_p9), %s171_s12, 4294967264 }
  0x3f   : > { %1067 = dma.done.wait (%p1159_p1), [#allocation8], 256  }
  0x40   : > { %1069 = vsyncadd (%p1159_p1), [#allocation8], 4294967040  ;;  %s210_s26 = sld [smem:[#allocation3]]  ;;  %v199_v0 = vld [vmem:[%s174_s13] sm:$0x1]  ;;  %v201_v3 = vlaneseq  ;;  %v207_v6 = vld [vmem:[#allocation7 + $0x8] sm:$0xff] }
  0x41   : > { %s785_s14 = sld [smem:[#allocation3 + $0x1]]  ;;  %v200_v2 = vld [vmem:[%s174_s13 + $0x1] sm:$0x1]  ;;  %425 = vmatprep.mubr.f32.mxu0 %v207_v6  ;;  %v587_v8 = vrot.slane %v207_v6, 4  ;;  %s784_s6 = sshll.u32 %s1234_s8, 3  ;;  %vm663_vm0 = vcmask 1043456  }
  0x42   : > { %s786_s0 = sld [smem:[#allocation3 + $0x2]]  ;;  %v1250_v14 = vshrl.u32 %v201_v3, 7  ;;  %s801_s7 = sshll.u32 %s1088_s18, 7 }
  0x43   : > { %s787_s21 = sld [smem:[#allocation3 + $0x3]]  ;;  %654 = vmatprep.mubr.f32.mxu1 %v587_v8  ;;  %s198_s10 = scalar_lea.vmem [#allocation9], %s784_s6 }
  0x44   : > { %s788_s27 = sld [smem:[#allocation3 + $0x4]]  ;;  %v203_v24 = vadd.s32 8, %v1250_v14  ;;  %v1256_v35 = vsub.s32 0, %v1250_v14  ;;  %v204_v43 = vcvt.s32.f32 %v1250_v14  ;;  %v303_v8 = vsub.s32 6, %v1250_v14  ;;  %s682_s12 = sshll.u32 %s198_s10, 4  ;;  %s683_s12 = int_to_ptr.vmem [resolvable:$true] %s682_s12 }
  0x45   : > { %s1246_s28 = sld [smem:[#allocation3 + $0x5]]  ;;  %s1101_s18 = smov [#allocation9]  }
  0x46   : > { %v221_v1 = vstv %s210_s26  ;;  %s792_s29 = sld [smem:[#allocation3 + $0x80]]  ;;  %v205_v40 = vcvt.s32.f32 %v203_v24 }
  0x47   : > { %v222_v4 = vmul.f32 %v221_v1, %v199_v0  ;;  %v223_v5 = vstv %s785_s14  ;;  %s793_s24 = sld [smem:[#allocation3 + $0x81]]  ;;  %s1391_s14 = scalar_lea.hbm %s1436_s3, %s801_s7 }
  0x48   : > { %v224_v7 = vmul.f32 %v223_v5, %v200_v2  ;;  %s1248_s22 = sld [smem:[#allocation3 + $0x82]]  ;;  %v226_v9 = vstv %s786_s0  ;;  %s667_s0 = scalar_lea.sflag [#allocation6], %s1234_s8 }
  0x49   : > { %v228_v10 = vstv %s787_s21  ;;  %s795_s23 = sld [smem:[#allocation3 + $0x83]]  ;;  %s1010_s21 = scalar_lea.vmem %s683_s12, 128 }
  0x4a   : > { %v225_v11 = vadd.f32 %v224_v7, %v222_v4  ;;  %v229_v12 = vmul.f32 %v228_v10, %v199_v0  ;;  %v230_v13 = vstv %s788_s27  ;;  %s796_s5 = sld [smem:[#allocation3 + $0x84]]  ;;  %p1011_p1 = scmp.ne.s32.totalorder %s683_s12, %s1010_s21 }
  0x4b   : > { %v231_v15 = vmul.f32 %v230_v13, %v200_v2  ;;  %s797_s4 = sld [smem:[#allocation3 + $0x85]]  ;;  %v233_v17 = vstv %s1246_s28  ;;  %s1014_s27 = sshll.u32 %s1101_s18, 4  ;;  %s1015_s27 = int_to_ptr.vmem [resolvable:$false] %s1014_s27 }
  0x4c   : > { %v227_v16 = vadd.f32 %v226_v9, %v225_v11  ;;  %v444_v18 = vstv %s792_s29  ;;  %p1012_p8 = pnand %p1011_p1, %p1211_p0  ;;  %s1016_s28 = scalar_lea.vmem %s1015_s27, 256 }
  0x4d   : > { %v232_v19 = vadd.f32 %v231_v15, %v229_v12  ;;  %v445_v20 = vmul.f32 %v444_v18, %v199_v0  ;;  %v446_v21 = vstv %s793_s24  ;;  %p1017_p11 = scmp.lt.s32.totalorder %s683_s12, %s1015_s27  ;;  %p1018_p2 = scmp.lt.s32.totalorder %s1016_s28, %s1010_s21 }
  0x4e   : > { %v235_v22 = vadd.f32 1.0, %v227_v16  ;;  %v447_v23 = vmul.f32 %v446_v21, %v200_v2  ;;  %v449_v26 = vstv %s1248_s22  ;;  %p1013_p13 = pneg %p1012_p8 }
  0x4f   : > { %v234_v25 = vadd.f32 %v233_v17, %v232_v19  ;;  %v451_v27 = vstv %s795_s23  ;;  %p1019_p12 = por %p1018_p2, %p1017_p11 }
  0x50   : > { %v236_v28 = vmul.f32 8.0, %v235_v22  ;;  %v448_v29 = vadd.f32 %v447_v23, %v445_v20  ;;  %v452_v30 = vmul.f32 %v451_v27, %v199_v0  ;;  %v453_v31 = vstv %s796_s5 }
  0x51   : > { %v238_v32 = vadd.f32 1.0, %v234_v25  ;;  %v454_v33 = vmul.f32 %v453_v31, %v200_v2  ;;  %v456_v37 = vstv %s797_s4  ;;  %v309_v2 = vsub.s32 7, %v1250_v14  ;;  %p1020_p3 = pnand %p1019_p12, %p1013_p13 }
  0x52   : > { %v790_v34 = vadd.f32 -0.5, %v236_v28  ;;  %v450_v36 = vadd.f32 %v449_v26, %v448_v29  ;;  %v297_v23 = vsub.s32 5, %v1250_v14  ;;  %v291_v31 = vsub.s32 4, %v1250_v14 }
  0x53   : > { %v239_v38 = vmul.f32 8.0, %v238_v32  ;;  %v455_v39 = vadd.f32 %v454_v33, %v452_v30 }
  0x54   : > { %v244_v41 = vrot.slane %v790_v34, %v1256_v35  ;;  %v458_v42 = vadd.f32 1.0, %v450_v36 }
  0x55   : > { %v791_v44 = vadd.f32 -0.5, %v239_v38  ;;  %v457_v45 = vadd.f32 %v456_v37, %v455_v39 }
  0x56   : > { %v246_v46 = vsub.f32 %v244_v41, %v205_v40  ;;  %v459_v47 = vmul.f32 8.0, %v458_v42  ;;  %v245_v48 = vsub.f32 %v244_v41, %v204_v43 }
  0x57   : > { %v256_v49 = vrot.slane %v791_v44, %v1256_v35  ;;  %v461_v50 = vadd.f32 1.0, %v457_v45 }
  0x58   : > { %v248_v51 = vand.u32 2147483647, %v246_v46  ;;  %v798_v52 = vadd.f32 -0.5, %v459_v47  ;;  %v247_v53 = vand.u32 2147483647, %v245_v48 }
  0x59   : > { %v258_v54 = vsub.f32 %v256_v49, %v205_v40  ;;  %v462_v55 = vmul.f32 8.0, %v461_v50  ;;  %v257_v56 = vsub.f32 %v256_v49, %v204_v43 }
  0x5a   : > { %v250_v57 = vsub.f32 1.0, %v248_v51  ;;  %v467_v58 = vrot.slane %v798_v52, %v1256_v35  ;;  %v249_v63 = vsub.f32 1.0, %v247_v53 }
  0x5b   : > { %v260_v59 = vand.u32 2147483647, %v258_v54  ;;  %v799_v60 = vadd.f32 -0.5, %v462_v55  ;;  %v259_v61 = vand.u32 2147483647, %v257_v56 }
  0x5c   : > { %v469_v62 = vsub.f32 %v467_v58, %v205_v40  ;;  %v468_v0 = vsub.f32 %v467_v58, %v204_v43  ;;  %v1264_v5 = vmax.f32 %v250_v57, 0.0  ;;  %v1271_v15 = vmax.f32 %v249_v63, 0.0 }
  0x5d   : > { %v262_v1 = vsub.f32 1.0, %v260_v59  ;;  %v479_v3 = vrot.slane %v799_v60, %v1256_v35  ;;  %v261_v4 = vsub.f32 1.0, %v259_v61  ;;  %v285_v57 = vsub.s32 3, %v1250_v14 }
  0x5e   : > { %v471_v6 = vand.u32 2147483647, %v469_v62  ;;  %v470_v7 = vand.u32 2147483647, %v468_v0 }
  0x5f   : > { %v1267_v9 = vmax.f32 %v262_v1, 0.0  ;;  %v481_v10 = vsub.f32 %v479_v3, %v205_v40  ;;  %v1269_v11 = vmax.f32 %v261_v4, 0.0  ;;  %v480_v12 = vsub.f32 %v479_v3, %v204_v43 }
  0x60   : > { %v473_v13 = vsub.f32 1.0, %v471_v6  ;;  %v472_v16 = vsub.f32 1.0, %v470_v7 }
  0x61   : > { %v358_v17 = vrot.slane %v1267_v9, %v309_v2  ;;  %v483_v18 = vand.u32 2147483647, %v481_v10  ;;  %v310_v19 = vrot.slane %v1269_v11, %v309_v2  ;;  %v482_v20 = vand.u32 2147483647, %v480_v12 }
  0x62   : > { %v352_v21 = vrot.slane %v1267_v9, %v303_v8  ;;  %v304_v22 = vrot.slane %v1269_v11, %v303_v8  ;;  %v1280_v28 = vmax.f32 %v473_v13, 0.0  ;;  %v1287_v33 = vmax.f32 %v472_v16, 0.0 }
  0x63   : > { %v360_v24 = vmul.f32 %v358_v17, %v1264_v5  ;;  %v485_v25 = vsub.f32 1.0, %v483_v18  ;;  %v312_v26 = vmul.f32 %v310_v19, %v1264_v5  ;;  %v484_v27 = vsub.f32 1.0, %v482_v20 }
  0x64   : > { %v359_v29 = vmul.f32 %v358_v17, %v1271_v15  ;;  %v311_v30 = vmul.f32 %v310_v19, %v1271_v15  ;;  %v354_v36 = vmul.f32 %v352_v21, %v1264_v5  ;;  %v306_v37 = vmul.f32 %v304_v22, %v1264_v5 }
  0x65   : > { %804 = vmatprep.subr.mxu0 %v360_v24  ;;  %v1285_v32 = vmax.f32 %v485_v25, 0.0  ;;  %v1289_v34 = vmax.f32 %v484_v27, 0.0  ;;  %v346_v38 = vrot.slane %v1267_v9, %v297_v23  ;;  %v298_v39 = vrot.slane %v1269_v11, %v297_v23 }
  0x66   : > { %805 = vmatpush3.msra.mxu0 %v312_v26  ;;  %v353_v43 = vmul.f32 %v352_v21, %v1271_v15  ;;  %v305_v45 = vmul.f32 %v304_v22, %v1271_v15  ;;  %v340_v46 = vrot.slane %v1267_v9, %v291_v31  ;;  %v292_v53 = vrot.slane %v1269_v11, %v291_v31 }
  0x67   : > { %v581_v40 = vrot.slane %v1285_v32, %v309_v2  ;;  %v533_v41 = vrot.slane %v1289_v34, %v309_v2  ;;  %806 = vmatprep.subr.mxu0 %v359_v29  ;;  %v575_v42 = vrot.slane %v1285_v32, %v303_v8  ;;  %v527_v44 = vrot.slane %v1289_v34, %v303_v8 }
  0x68   : > { %807 = vmatpush3.msra.mxu0 %v311_v30  ;;  %v348_v50 = vmul.f32 %v346_v38, %v1264_v5  ;;  %v300_v52 = vmul.f32 %v298_v39, %v1264_v5  ;;  %v569_v55 = vrot.slane %v1285_v32, %v297_v23  ;;  %v347_v56 = vmul.f32 %v346_v38, %v1271_v15 }
  0x69   : > { %v583_v47 = vmul.f32 %v581_v40, %v1280_v28  ;;  %v535_v48 = vmul.f32 %v533_v41, %v1280_v28  ;;  %v582_v49 = vmul.f32 %v581_v40, %v1287_v33  ;;  %808 = vmatprep.subr.mxu0 %v354_v36  ;;  %v534_v51 = vmul.f32 %v533_v41, %v1287_v33 }
  0x6a   : > { %809 = vmatpush3.msra.mxu0 %v306_v37  ;;  %v577_v54 = vmul.f32 %v575_v42, %v1280_v28  ;;  %v529_v58 = vmul.f32 %v527_v44, %v1280_v28  ;;  %v521_v59 = vrot.slane %v1289_v34, %v297_v23  ;;  %v299_v60 = vmul.f32 %v298_v39, %v1271_v15 }
  0x6b   : > { %839 = vmatprep.subr.mxu1 %v583_v47  ;;  %810 = vmatprep.subr.mxu0 %v353_v43  ;;  %v576_v61 = vmul.f32 %v575_v42, %v1287_v33  ;;  %v528_v62 = vmul.f32 %v527_v44, %v1287_v33  ;;  %v342_v63 = vmul.f32 %v340_v46, %v1264_v5  ;;  %v279_v10 = vsub.s32 2, %v1250_v14 }
  0x6c   : > { %840 = vmatpush3.msra.mxu1 %v535_v48  ;;  %811 = vmatpush3.msra.mxu0 %v305_v45  ;;  %v563_v0 = vrot.slane %v1285_v32, %v291_v31  ;;  %v294_v1 = vmul.f32 %v292_v53, %v1264_v5  ;;  %v515_v2 = vrot.slane %v1289_v34, %v291_v31  ;;  %v273_v17 = vsub.s32 1, %v1250_v14 }
  0x6d   : > { %841 = vmatprep.subr.mxu1 %v582_v49  ;;  %812 = vmatprep.subr.mxu0 %v348_v50  ;;  %v571_v3 = vmul.f32 %v569_v55, %v1280_v28  ;;  %v341_v4 = vmul.f32 %v340_v46, %v1271_v15  ;;  %v334_v6 = vrot.slane %v1267_v9, %v285_v57 }
  0x6e   : > { %842 = vmatpush3.msra.mxu1 %v534_v51  ;;  %813 = vmatpush3.msra.mxu0 %v300_v52  ;;  %v523_v7 = vmul.f32 %v521_v59, %v1280_v28  ;;  %v293_v8 = vmul.f32 %v292_v53, %v1271_v15  ;;  %v570_v12 = vmul.f32 %v569_v55, %v1287_v33 }
  0x6f   : > { %843 = vmatprep.subr.mxu1 %v577_v54  ;;  %814 = vmatprep.subr.mxu0 %v347_v56  ;;  %v336_v13 = vmul.f32 %v334_v6, %v1264_v5  ;;  %v286_v16 = vrot.slane %v1269_v11, %v285_v57  ;;  %v522_v18 = vmul.f32 %v521_v59, %v1287_v33 }
  0x70   : > { %844 = vmatpush3.msra.mxu1 %v529_v58  ;;  %815 = vmatpush3.msra.mxu0 %v299_v60  ;;  %v565_v19 = vmul.f32 %v563_v0, %v1280_v28  ;;  %v517_v20 = vmul.f32 %v515_v2, %v1280_v28  ;;  %v557_v21 = vrot.slane %v1285_v32, %v285_v57 }
  0x71   : > { %845 = vmatprep.subr.mxu1 %v576_v61  ;;  %816 = vmatprep.subr.mxu0 %v342_v63  ;;  %v288_v22 = vmul.f32 %v286_v16, %v1264_v5  ;;  %v335_v23 = vmul.f32 %v334_v6, %v1271_v15  ;;  %v509_v14 = vrot.slane %v1289_v34, %v285_v57 }
  0x72   : > { %846 = vmatpush3.msra.mxu1 %v528_v62  ;;  %817 = vmatpush3.msra.mxu0 %v294_v1  ;;  %v287_v24 = vmul.f32 %v286_v16, %v1271_v15  ;;  %v328_v25 = vrot.slane %v1267_v9, %v279_v10  ;;  %v564_v26 = vmul.f32 %v563_v0, %v1287_v33 }
  0x73   : > { %847 = vmatprep.subr.mxu1 %v571_v3  ;;  %818 = vmatprep.subr.mxu0 %v341_v4  ;;  %v280_v27 = vrot.slane %v1269_v11, %v279_v10  ;;  %v322_v29 = vrot.slane %v1267_v9, %v273_v17  ;;  %v516_v30 = vmul.f32 %v515_v2, %v1287_v33 }
  0x74   : > { %848 = vmatpush3.msra.mxu1 %v523_v7  ;;  %819 = vmatpush3.msra.mxu0 %v293_v8  ;;  %v330_v31 = vmul.f32 %v328_v25, %v1264_v5  ;;  %v551_v36 = vrot.slane %v1285_v32, %v279_v10  ;;  %v559_v37 = vmul.f32 %v557_v21, %v1280_v28 }
  0x75   : > { %849 = vmatprep.subr.mxu1 %v570_v12  ;;  %820 = vmatprep.subr.mxu0 %v336_v13  ;;  %v282_v38 = vmul.f32 %v280_v27, %v1264_v5  ;;  %v329_v39 = vmul.f32 %v328_v25, %v1271_v15  ;;  %v511_v40 = vmul.f32 %v509_v14, %v1280_v28 }
  0x76   : > { %850 = vmatpush3.msra.mxu1 %v522_v18  ;;  %821 = vmatpush3.msra.mxu0 %v288_v22  ;;  %v503_v41 = vrot.slane %v1289_v34, %v279_v10  ;;  %v281_v42 = vmul.f32 %v280_v27, %v1271_v15  ;;  %v558_v43 = vmul.f32 %v557_v21, %v1287_v33 }
  0x77   : > { %851 = vmatprep.subr.mxu1 %v565_v19  ;;  %822 = vmatprep.subr.mxu0 %v335_v23  ;;  %v324_v44 = vmul.f32 %v322_v29, %v1264_v5  ;;  %v274_v45 = vrot.slane %v1269_v11, %v273_v17  ;;  %v510_v46 = vmul.f32 %v509_v14, %v1287_v33 }
  0x78   : > { %852 = vmatpush3.msra.mxu1 %v517_v20  ;;  %823 = vmatpush3.msra.mxu0 %v287_v24  ;;  %v553_v47 = vmul.f32 %v551_v36, %v1280_v28  ;;  %v316_v48 = vrot.slane %v1267_v9, %v1256_v35  ;;  %v545_v49 = vrot.slane %v1285_v32, %v273_v17 }
  0x79   : > { %853 = vmatprep.subr.mxu1 %v564_v26  ;;  %824 = vmatprep.subr.mxu0 %v330_v31  ;;  %v276_v50 = vmul.f32 %v274_v45, %v1264_v5  ;;  %v323_v51 = vmul.f32 %v322_v29, %v1271_v15  ;;  %v505_v52 = vmul.f32 %v503_v41, %v1280_v28 }
  0x7a   : > { %854 = vmatpush3.msra.mxu1 %v516_v30  ;;  %825 = vmatpush3.msra.mxu0 %v282_v38  ;;  %v497_v53 = vrot.slane %v1289_v34, %v273_v17  ;;  %v275_v54 = vmul.f32 %v274_v45, %v1271_v15  ;;  %v552_v55 = vmul.f32 %v551_v36, %v1287_v33 }
  0x7b   : > { %855 = vmatprep.subr.mxu1 %v559_v37  ;;  %826 = vmatprep.subr.mxu0 %v329_v39  ;;  %v318_v9 = vmul.f32 %v316_v48, %v1264_v5  ;;  %v268_v56 = vrot.slane %v1269_v11, %v1256_v35  ;;  %v504_v57 = vmul.f32 %v503_v41, %v1287_v33 }
  0x7c   : > { %856 = vmatpush3.msra.mxu1 %v511_v40  ;;  %827 = vmatpush3.msra.mxu0 %v281_v42  ;;  %v539_v58 = vrot.slane %v1285_v32, %v1256_v35  ;;  %v547_v59 = vmul.f32 %v545_v49, %v1280_v28  ;;  %v317_v61 = vmul.f32 %v316_v48, %v1271_v15 }
  0x7d   : > { %857 = vmatprep.subr.mxu1 %v558_v43  ;;  %828 = vmatprep.subr.mxu0 %v324_v44  ;;  %v270_v60 = vmul.f32 %v268_v56, %v1264_v5  ;;  %v499_v62 = vmul.f32 %v497_v53, %v1280_v28  ;;  %v491_v11 = vrot.slane %v1289_v34, %v1256_v35  ;;  %v206_v35 = vld [vmem:[#allocation7] sm:$0xff] }
  0x7e   : > { %858 = vmatpush3.msra.mxu1 %v510_v46  ;;  %829 = vmatpush3.msra.mxu0 %v276_v50  ;;  %v269_v63 = vmul.f32 %v268_v56, %v1271_v15  ;;  %v546_v32 = vmul.f32 %v545_v49, %v1287_v33  ;;  %v498_v0 = vmul.f32 %v497_v53, %v1287_v33  ;;  %v586_v2 = vrot.slane %v206_v35, 4 }
  0x7f   : > { %859 = vmatprep.subr.mxu1 %v553_v47  ;;  %830 = vmatprep.subr.mxu0 %v323_v51  ;;  %v541_v5 = vmul.f32 %v539_v58, %v1280_v28  ;;  %v493_v1 = vmul.f32 %v491_v11, %v1280_v28  ;;  %v540_v15 = vmul.f32 %v539_v58, %v1287_v33 }
  0x80   : > { %860 = vmatpush3.msra.mxu1 %v505_v52  ;;  %831 = vmatpush3.msra.mxu0 %v275_v54  ;;  %v492_v34 = vmul.f32 %v491_v11, %v1287_v33 }
  0x81   : > { %861 = vmatprep.subr.mxu1 %v552_v55  ;;  %832 = vmatprep.subr.mxu0 %v318_v9 }
  0x82   : > { %862 = vmatpush3.msra.mxu1 %v504_v57  ;;  %833 = vmatpush3.msra.mxu0 %v270_v60 }
  0x83   : > { %863 = vmatprep.subr.mxu1 %v547_v59  ;;  %834 = vmatprep.subr.mxu0 %v317_v61 }
  0x84   : > { %864 = vmatpush3.msra.mxu1 %v499_v62  ;;  %835 = vmatpush3.msra.mxu0 %v269_v63 }
  0x85   : > { %865 = vmatprep.subr.mxu1 %v546_v32  ;;  %426 = vmatmul.mubr.f32.vlgmr.msra.gmra.mxu0 %v206_v35 }
  0x86   : > { %866 = vmatpush3.msra.mxu1 %v498_v0 }
  0x87   : > { %867 = vmatprep.subr.mxu1 %v541_v5 }
  0x88   : > { %868 = vmatpush3.msra.mxu1 %v493_v1 }
  0x89   : > { %869 = vmatprep.subr.mxu1 %v540_v15 }
  0x8a   : > { %870 = vmatpush3.msra.mxu1 %v492_v34 }
  0x8b   : > { %655 = vmatmul.mubr.f32.vlgmr.msra.gmra.mxu1 %v586_v2 }
 0x145   : > { %v836_v3 = vpop.f32.mrf.mxu0 }
 0x147   : > { %v837_v4 = vpop.f32.mrf.mxu0 }
 0x148   : > { %v838_v8 = vadd.f32 %v837_v4, %v836_v3 }
 0x14b   : > { %v871_v28 = vpop.f32.mrf.mxu1 }
 0x14d   : > { %v872_v6 = vpop.f32.mrf.mxu1 }
 0x14e   : > { %v873_v7 = vadd.f32 %v872_v6, %v871_v28 }
 0x150   : > { %v661_v33 = vrot.slane %v873_v7, 4 }
 0x152   : > { %v664_v10 = vsel %vm663_vm0, %v838_v8, %v661_v33 }
 0x153   : > { %665 = vst [vmem:[%s198_s10] sm:$0xff] %v664_v10 }
 0x154   : > { %1023 = shalt.err (!%p1020_p3)
}
 0x155   : > { %s1024_s29 = scalar_lea.hbm %s1391_s14, 128  ;;  %s1028_s22 = scalar_lea.hbm %s1436_s3, 256 }
 0x156   : > { %p1025_p5 = scmp.ne.s32.totalorder %s1391_s14, %s1024_s29  ;;  %p1029_p4 = scmp.lt.s32.totalorder %s1391_s14, %s1436_s3 }
 0x157   : > { %p1030_p10 = scmp.lt.s32.totalorder %s1028_s22, %s1024_s29 }
 0x158   : > { %p1026_p7 = pnand %p1025_p5, %p1211_p0 }
 0x159   : > { %p1031_p9 = por %p1030_p10, %p1029_p4 }
 0x15a   : > { %p1027_p6 = pneg %p1026_p7 }
 0x15c   : > { %p1032_p1 = pnand %p1031_p9, %p1027_p6 }
 0x15e   : > { %1035 = shalt.err (!%p1032_p1)
}
 0x15f   : > { %880 = dma.vmem_to_hbm [thread:$0]  (%p1211_p0), %s683_s12, 128, %s1391_s14, %s667_s0  }
 0x160 PF: > { %s694_s4 = sand.u32 1, %s1076_s15   ;;  %p1447_p8 = scmp.ne.s32.totalorder %s1441_s25, 0 }
 0x161   : > { %p1448_p13 = scmp.ge.s32.totalorder %s1096_s20, 2  ;;  %s695_s6 = scalar_lea.sflag [#allocation6], %s694_s4 }
 0x163   : > { %p891_p11 = pnand %p1448_p13, %p1447_p8 }
 0x165   : > { %p892_p2 = pneg %p891_p11 }
 0x167   : > { %1071 = dma.done.wait (%p892_p2), %s695_s6, 128  }
 0x168   : > { %1073 = vsyncadd (%p892_p2), %s695_s6, 4294967168  ;;  %s24_s20 = sadd.s32 1, %s1096_s20   ;;  %s1449_s15 = smov %s1080_s16 }
 0x169   : > { %p21_p12 = scmp.ge.s32.totalorder %s24_s20, 4   ;;  %s1450_s16 = smov %s1084_s17 }
 0x16a   : > { %s1451_s17 = smov %s1217_s11  ;;  %s1452_s18 = smov %s1092_s19 }
 0x16b   : > { %s1453_s19 = smov %s1455_s30  ;;  %23 = sbr.rel (!%p21_p12) target bundleno = 12 (0xc), region = 78 }
 0x170   :  { %700 = vsyncpa [#allocation5], 1 }
 0x171   :  { %702 = vsyncpa [#allocation5 + $0x1], 1 }
 0x172   :  { %703 = vsyncpa [#allocation8], 1 }
 0x173   :  { %704 = vsyncpa [#allocation6], 1 }
 0x174   :  { %706 = vsyncpa [#allocation6 + $0x1], 1 }

</bundles_post_ra>
